<compile_context>
chip_gen: v6e
topology: v6e:2x2x1
jax: 0.10.0
libtpu: 0.0.40
codegen_flags: <defaults>
</compile_context>

<pallas_src>
import functools

import jax
import jax.numpy as jnp
from jax import lax
from jax.experimental import pallas as pl
from jax.experimental.pallas import tpu as pltpu


def qnetwork_kernel(x_ref, w1_ref, b1_ref, w2_ref, b2_ref, w3_ref, b3_ref,
                    o_ref, *, n_layers):
    # x arrives bf16; weights stay bf16 -> every matmul is a native bf16xbf16
    # MXU pass with f32 accumulation (no multi-pass f32 MXU mode, no VPU
    # up-cast of weight copies that would stay live across the unrolled loop).
    x = x_ref[...]          # (TB, state_size) bf16
    w1 = w1_ref[...]        # (state_size, n_units) bf16
    w2 = w2_ref[...]        # (n_units, n_units) bf16
    w3 = w3_ref[...]        # (n_units, action_size) bf16

    # Biases / elementwise epilogues in f32 (v5e VPU/EUP have no bf16 path).
    b1 = b1_ref[...].astype(jnp.float32)
    b3 = b3_ref[...].astype(jnp.float32)

    # first_fc + ReLU.
    h = jnp.maximum(
        jnp.dot(x, w1, preferred_element_type=jnp.float32) + b1, 0.0)

    # Hoist the (1, n_units) -> (TB, n_units) bias broadcast out of the
    # unrolled loop: with unroll=True each iteration would re-emit it.
    b2 = jnp.broadcast_to(b2_ref[...].astype(jnp.float32), h.shape)

    # middle_fc applied (n_layers - 1) times with the SAME weights, ReLU each.
    def body(_, h):
        return jnp.maximum(
            jnp.dot(h.astype(jnp.bfloat16), w2,
                    preferred_element_type=jnp.float32) + b2, 0.0)

    h = lax.fori_loop(0, n_layers - 1, body, h, unroll=True)

    # last_fc (no activation), f32 output.
    o_ref[...] = (jnp.dot(h.astype(jnp.bfloat16), w3,
                          preferred_element_type=jnp.float32) + b3
                  ).astype(o_ref.dtype)


def qnetwork_forward(x, params, *, n_layers, block_batch=4096):
    """x: (B, state_size). params: bf16 (W1, b1, W2, b2, W3, b3) with W_i
    transposed vs. PyTorch (in_features, out_features), b_i (1, out).
    Output is f32 (B, action_size)."""
    w1, b1, w2, b2, w3, b3 = params
    batch, state_size = x.shape
    n_units = w1.shape[1]
    action_size = w3.shape[1]

    # bf16 input stream halves the dominant HBM->VMEM DMA; the matmul input
    # is bf16 anyway, so no extra precision is lost.
    if x.dtype != jnp.bfloat16:
        x = x.astype(jnp.bfloat16)

    def round_up(v, m):
        return ((v + m - 1) // m) * m

    # Batch tile: big tiles amortize the per-grid-step overhead. Keep tb a
    # multiple of 8 (sublanes) when tiling, and force grid >= 2 for non-tiny
    # batches so v7x's two TensorCores can split the "parallel" batch axis.
    if batch <= 16:
        tb = batch                      # single full-extent block
    else:
        tb = max(8, min(block_batch, round_up(pl.cdiv(batch, 2), 8)))
    grid = (pl.cdiv(batch, tb),)

    x_spec = pl.BlockSpec((tb, state_size), lambda i: (i, 0))
    out_spec = pl.BlockSpec((tb, action_size), lambda i: (i, 0))

    def resident(p):
        # Same block index every grid step -> stays VMEM-resident with no
        # re-DMA; Buffered(1) drops the pointless second pipeline buffer.
        return pl.BlockSpec(p.shape, lambda i: (0, 0),
                            pipeline_mode=pl.Buffered(1))

    in_specs = [
        x_spec,
        resident(w1), resident(b1),
        resident(w2), resident(b2),
        resident(w3), resident(b3),
    ]

    flops = 2 * batch * (state_size * n_units
                         + (n_layers - 1) * n_units * n_units
                         + n_units * action_size)
    bytes_accessed = (x.size * x.dtype.itemsize
                      + sum(p.size * p.dtype.itemsize for p in params)
                      + batch * action_size * 4)
    cost = pl.CostEstimate(flops=flops, transcendentals=0,
                           bytes_accessed=bytes_accessed)

    return pl.pallas_call(
        functools.partial(qnetwork_kernel, n_layers=n_layers),
        out_shape=jax.ShapeDtypeStruct((batch, action_size), jnp.float32),
        grid=grid,
        in_specs=in_specs,
        out_specs=out_spec,
        compiler_params=pltpu.CompilerParams(
            dimension_semantics=("parallel",),
            # Lane-padded x/out/h tiles at tb=4096 can exceed v5e's 16 MiB
            # default scoped VMEM; 48 MiB is still < v7x's 64 MiB physical.
            vmem_limit_bytes=48 * 1024 * 1024),
        cost_estimate=cost,
    )(x, w1, b1, w2, b2, w3, b3)


def init_linear(key, fan_in, fan_out, dtype=jnp.bfloat16):
    """PyTorch nn.Linear default init: U(-1/sqrt(fan_in), 1/sqrt(fan_in)).
    Weight returned transposed -> (fan_in, fan_out); bias -> (1, fan_out).
    Stored in bf16 (halves weight DMA / VMEM residency; numerics therefore
    match a bf16-cast reference, not an f32 PyTorch module bit-for-bit)."""
    kw, kb = jax.random.split(key)
    bound = 1.0 / jnp.sqrt(float(fan_in))
    w = jax.random.uniform(kw, (fan_in, fan_out), jnp.float32, -bound, bound)
    b = jax.random.uniform(kb, (1, fan_out), jnp.float32, -bound, bound)
    return w.astype(dtype), b.astype(dtype)


if __name__ == "__main__":
    # Small shapes consistent with the module's forward.
    # Note: model widths (state=8, hidden=32, action=4) pad to (8,128) vregs,
    # so MXU utilization is inherently tiny; throughput at scale comes from
    # the batch grid + DMA pipelining, not matmul tuning.
    batch = 2
    state_size = 8
    action_size = 4
    n_units = 32
    n_layers = 2

    key = jax.random.PRNGKey(0)
    k_x, k1, k2, k3 = jax.random.split(key, 4)

    x = jax.random.normal(k_x, (batch, state_size), dtype=jnp.float32)
    w1, b1 = init_linear(k1, state_size, n_units)
    w2, b2 = init_linear(k2, n_units, n_units)
    w3, b3 = init_linear(k3, n_units, action_size)
    params = (w1, b1, w2, b2, w3, b3)

    out = qnetwork_forward(x, params, n_layers=n_layers)
    out = jax.block_until_ready(out)

    # Pure-JAX reference mirroring the kernel's dtype flow: bf16 matmul
    # operands (exact products in f32), f32 accumulate/epilogue.
    def bf(a):
        return a.astype(jnp.bfloat16).astype(jnp.float32)

    w1f, b1f = w1.astype(jnp.float32), b1.astype(jnp.float32)
    w2f, b2f = w2.astype(jnp.float32), b2.astype(jnp.float32)
    w3f, b3f = w3.astype(jnp.float32), b3.astype(jnp.float32)
    h = jnp.maximum(bf(x) @ w1f + b1f, 0.0)
    for _ in range(n_layers - 1):
        h = jnp.maximum(bf(h) @ w2f + b2f, 0.0)
    ref = bf(h) @ w3f + b3f

    assert out.shape == (batch, action_size)
    assert jnp.allclose(out, ref, atol=2e-2, rtol=2e-2)
    print("KERNEL_OK")
</pallas_src>

<mosaic_0001>
module attributes {stable_mosaic.version = 11 : i64} {
  func.func @qnetwork_kernel(%arg0: i32, %arg1: memref<2x8xbf16, #tpu.memory_space<vmem>>, %arg2: memref<8x32xbf16, #tpu.memory_space<vmem>>, %arg3: memref<1x32xbf16, #tpu.memory_space<vmem>>, %arg4: memref<32x32xbf16, #tpu.memory_space<vmem>>, %arg5: memref<1x32xbf16, #tpu.memory_space<vmem>>, %arg6: memref<32x4xbf16, #tpu.memory_space<vmem>>, %arg7: memref<1x4xbf16, #tpu.memory_space<vmem>>, %arg8: memref<2x4xf32, #tpu.memory_space<vmem>>) attributes {dimension_semantics = [#tpu.dimension_semantics<parallel>], iteration_bounds = array<i64: 1>, scalar_prefetch = 0 : i64, scratch_operands = 0 : i64, tpu.core_type = #tpu.core_type<tc>, window_params = [{transform_indices = @transform_0, window_bounds = array<i64: 2, 8>}, {pipeline_mode = #tpu.pipeline_mode<synchronous>, transform_indices = @transform_1, window_bounds = array<i64: 8, 32>}, {pipeline_mode = #tpu.pipeline_mode<synchronous>, transform_indices = @transform_2, window_bounds = array<i64: 1, 32>}, {pipeline_mode = #tpu.pipeline_mode<synchronous>, transform_indices = @transform_3, window_bounds = array<i64: 32, 32>}, {pipeline_mode = #tpu.pipeline_mode<synchronous>, transform_indices = @transform_4, window_bounds = array<i64: 1, 32>}, {pipeline_mode = #tpu.pipeline_mode<synchronous>, transform_indices = @transform_5, window_bounds = array<i64: 32, 4>}, {pipeline_mode = #tpu.pipeline_mode<synchronous>, transform_indices = @transform_6, window_bounds = array<i64: 1, 4>}, {transform_indices = @transform_7, window_bounds = array<i64: 2, 4>}]} {
    %c0 = arith.constant 0 : index
    %c0_0 = arith.constant 0 : index
    %0 = vector.load %arg1[%c0, %c0_0] : memref<2x8xbf16, #tpu.memory_space<vmem>>, vector<2x8xbf16>
    %c0_1 = arith.constant 0 : index
    %c0_2 = arith.constant 0 : index
    %1 = vector.load %arg2[%c0_1, %c0_2] : memref<8x32xbf16, #tpu.memory_space<vmem>>, vector<8x32xbf16>
    %c0_3 = arith.constant 0 : index
    %c0_4 = arith.constant 0 : index
    %2 = vector.load %arg4[%c0_3, %c0_4] : memref<32x32xbf16, #tpu.memory_space<vmem>>, vector<32x32xbf16>
    %c0_5 = arith.constant 0 : index
    %c0_6 = arith.constant 0 : index
    %3 = vector.load %arg6[%c0_5, %c0_6] : memref<32x4xbf16, #tpu.memory_space<vmem>>, vector<32x4xbf16>
    %c0_7 = arith.constant 0 : index
    %c0_8 = arith.constant 0 : index
    %4 = vector.load %arg3[%c0_7, %c0_8] : memref<1x32xbf16, #tpu.memory_space<vmem>>, vector<1x32xbf16>
    %5 = arith.extf %4 : vector<1x32xbf16> to vector<1x32xf32>
    %c0_9 = arith.constant 0 : index
    %c0_10 = arith.constant 0 : index
    %6 = vector.load %arg7[%c0_9, %c0_10] : memref<1x4xbf16, #tpu.memory_space<vmem>>, vector<1x4xbf16>
    %7 = arith.extf %6 : vector<1x4xbf16> to vector<1x4xf32>
    %cst = arith.constant dense<0.000000e+00> : vector<2x32xf32>
    %8 = tpu.matmul %0, %1, %cst {dimension_numbers = #tpu.dot_dimension_numbers<[1], [0], [0], [1], [0, 0, 1, 1], [], []>} : vector<2x8xbf16>, vector<8x32xbf16>, vector<2x32xf32> -> vector<2x32xf32>
    %9 = vector.broadcast %5 : vector<1x32xf32> to vector<2x32xf32>
    %10 = arith.addf %8, %9 : vector<2x32xf32>
    %cst_11 = arith.constant 0.000000e+00 : f32
    %11 = vector.broadcast %cst_11 : f32 to vector<2x32xf32>
    %12 = arith.maximumf %10, %11 : vector<2x32xf32>
    %c0_12 = arith.constant 0 : index
    %c0_13 = arith.constant 0 : index
    %13 = vector.load %arg5[%c0_12, %c0_13] : memref<1x32xbf16, #tpu.memory_space<vmem>>, vector<1x32xbf16>
    %14 = arith.extf %13 : vector<1x32xbf16> to vector<1x32xf32>
    %15 = vector.shape_cast %14 : vector<1x32xf32> to vector<1x32xf32>
    %16 = vector.broadcast %15 : vector<1x32xf32> to vector<2x32xf32>
    %c0_i32 = arith.constant 0 : i32
    %17 = arith.truncf %12 : vector<2x32xf32> to vector<2x32xbf16>
    %cst_14 = arith.constant dense<0.000000e+00> : vector<2x32xf32>
    %18 = tpu.matmul %17, %2, %cst_14 {dimension_numbers = #tpu.dot_dimension_numbers<[1], [0], [0], [1], [0, 0, 1, 1], [], []>} : vector<2x32xbf16>, vector<32x32xbf16>, vector<2x32xf32> -> vector<2x32xf32>
    %19 = arith.addf %18, %16 : vector<2x32xf32>
    %cst_15 = arith.constant 0.000000e+00 : f32
    %20 = vector.broadcast %cst_15 : f32 to vector<2x32xf32>
    %21 = arith.maximumf %19, %20 : vector<2x32xf32>
    %22 = arith.truncf %21 : vector<2x32xf32> to vector<2x32xbf16>
    %cst_16 = arith.constant dense<0.000000e+00> : vector<2x4xf32>
    %23 = tpu.matmul %22, %3, %cst_16 {dimension_numbers = #tpu.dot_dimension_numbers<[1], [0], [0], [1], [0, 0, 1, 1], [], []>} : vector<2x32xbf16>, vector<32x4xbf16>, vector<2x4xf32> -> vector<2x4xf32>
    %24 = vector.broadcast %7 : vector<1x4xf32> to vector<2x4xf32>
    %25 = arith.addf %23, %24 : vector<2x4xf32>
    %c0_17 = arith.constant 0 : index
    %c0_18 = arith.constant 0 : index
    %26 = vector.load %arg8[%c0_17, %c0_18] : memref<2x4xf32, #tpu.memory_space<vmem>>, vector<2x4xf32>
    tpu.vector_store %arg8[%c0_17, %c0_18], %25 {strides = array<i32>} : memref<2x4xf32, #tpu.memory_space<vmem>>, vector<2x4xf32>,
    return
  }
  func.func @transform_0(%arg0: i32) -> (i32, i32) {
    %c0_i32 = arith.constant 0 : i32
    %c0_i32_0 = arith.constant 0 : i32
    return %arg0, %c0_i32 : i32, i32
  }
  func.func @transform_1(%arg0: i32) -> (i32, i32) {
    %c0_i32 = arith.constant 0 : i32
    %c0_i32_0 = arith.constant 0 : i32
    %c0_i32_1 = arith.constant 0 : i32
    return %c0_i32, %c0_i32_0 : i32, i32
  }
  func.func @transform_2(%arg0: i32) -> (i32, i32) {
    %c0_i32 = arith.constant 0 : i32
    %c0_i32_0 = arith.constant 0 : i32
    %c0_i32_1 = arith.constant 0 : i32
    return %c0_i32, %c0_i32_0 : i32, i32
  }
  func.func @transform_3(%arg0: i32) -> (i32, i32) {
    %c0_i32 = arith.constant 0 : i32
    %c0_i32_0 = arith.constant 0 : i32
    %c0_i32_1 = arith.constant 0 : i32
    return %c0_i32, %c0_i32_0 : i32, i32
  }
  func.func @transform_4(%arg0: i32) -> (i32, i32) {
    %c0_i32 = arith.constant 0 : i32
    %c0_i32_0 = arith.constant 0 : i32
    %c0_i32_1 = arith.constant 0 : i32
    return %c0_i32, %c0_i32_0 : i32, i32
  }
  func.func @transform_5(%arg0: i32) -> (i32, i32) {
    %c0_i32 = arith.constant 0 : i32
    %c0_i32_0 = arith.constant 0 : i32
    %c0_i32_1 = arith.constant 0 : i32
    return %c0_i32, %c0_i32_0 : i32, i32
  }
  func.func @transform_6(%arg0: i32) -> (i32, i32) {
    %c0_i32 = arith.constant 0 : i32
    %c0_i32_0 = arith.constant 0 : i32
    %c0_i32_1 = arith.constant 0 : i32
    return %c0_i32, %c0_i32_0 : i32, i32
  }
  func.func @transform_7(%arg0: i32) -> (i32, i32) {
    %c0_i32 = arith.constant 0 : i32
    %c0_i32_0 = arith.constant 0 : i32
    return %arg0, %c0_i32 : i32, i32
  }
}

</mosaic_0001>

<bundles_post_ra>
// kernel: tpu_custom_call.1
= control target key start
LH: loop header
LB: loop body
LE: loop exit
PB: predicated region body
PF: predicated region fallthrough
CT: control target
= control target key end

     0   :  { %vm50_vm0 = vcmask 1043456   ;;  %v301_v1 = vmov 0.0   ;;  %vm302_vm1 = vmmov 0   ;;  %vm46_vm2 = vcmask 64512   ;;  %s376_s0 = inlined_call_operand.vmem [shape: bf16[2,8], index: 0, kind: input, shape index: {}]   ;;  %s377_s1 = inlined_call_operand.vmem [shape: bf16[8,32], index: 1, kind: input, shape index: {}]   ;;  %s378_s2 = inlined_call_operand.vmem [shape: bf16[1,32], index: 2, kind: input, shape index: {}]   ;;  %s379_s3 = inlined_call_operand.vmem [shape: bf16[32,32], index: 3, kind: input, shape index: {}]   ;;  %s380_s4 = inlined_call_operand.vmem [shape: bf16[1,32], index: 4, kind: input, shape index: {}]   ;;  %s381_s5 = inlined_call_operand.vmem [shape: bf16[32,4], index: 5, kind: input, shape index: {}]   ;;  %s382_s6 = inlined_call_operand.vmem [shape: bf16[1,4], index: 6, kind: input, shape index: {}]   ;;  %s383_s7 = inlined_call_operand.hbm [shape: f32[2,4], index: 7, kind: output, shape index: {}]  }
   0x1   :  { %v29_v0 = vld [vmem:[%s377_s1] sm:$0xf]  ;;  %250 = vmatprep.subr.bf16.mxu0 %v301_v1  ;;  %252 = vmatprep.mubr.msk.bf16.mxu0 %vm302_vm1, %v301_v1 }
   0x2   :  { %v52_v2 = vsel %vm50_vm0, %v29_v0, 0  ;;  %v28_v3 = vld [vmem:[%s376_s0] sm:$0x1]  ;;  %256 = vmatprep.subr.bf16.mxu1 %v301_v1  ;;  %260 = vmatprep.mubr.msk.bf16.mxu1 %vm302_vm1, %v301_v1 }
   0x3   :  { %251 = vmatpush3.bf16.msra.mxu0 %v52_v2 }
   0x4   :  { %264 = vmatprep.subr.bf16.mxu0 %v301_v1 }
   0x6   :  { %253 = vmatmul.mubr.msk.bf16.vlgmr.msra.gmra.mxu0 %vm46_vm2, %v28_v3 }
   0x7   :  { %12 = vsyncpa [#allocation3], 0  ;;  %268 = vmatprep.mubr.msk.bf16.mxu0 %vm302_vm1, %v301_v1  ;;  %v275_v4 = vld [vmem:[%s379_s3 + $0x8] sm:$0xff]   ;;  %v276_v5 = vld [vmem:[%s379_s3] sm:$0xff]   ;;  %v42_v7 = vlaneseq  ;;  %vm114_vm3 = vcmask 261120   ;;  %vm219_vm4 = vcmask 25600  }
   0x8   :  { %257 = vmatpush3.bf16.msra.mxu1 %v275_v4  ;;  %v277_v6 = vld [vmem:[%s381_s5 + $0x8] sm:$0xff]   ;;  %v38_v9 = vld [vmem:[%s378_s2] sm:$0x1] }
   0x9   :  { %258 = vmatprep.subr.bf16.mxu1 %v301_v1  ;;  %265 = vmatpush3.bf16.msra.mxu0 %v277_v6  ;;  %v43_v8 = vshrl.u32 %v42_v7, 7  ;;  %v39_v10 = vunpack.c.l.bf16 %v38_v9  ;;  %v278_v20 = vld [vmem:[%s381_s5] sm:$0xff]   ;;  %s303_s5 = smov [#allocation2]  }
   0xa   :  { %266 = vmatprep.subr.bf16.mxu0 %v301_v1  ;;  %v95_v21 = vld [vmem:[%s380_s4] sm:$0x1]  ;;  %s227_s15 = sshll.u32 %s303_s5, 4  ;;  %s228_s15 = int_to_ptr.vmem [resolvable:$true] %s227_s15 }
   0xb   :  { %v44_v11 = vsub.s32 0, %v43_v8  ;;  %v96_v22 = vunpack.c.l.bf16 %v95_v21  ;;  %v40_v31 = vld [vmem:[%s382_s6] sm:$0x1]  ;;  %s279_s4 = scalar_lea.vmem %s228_s15, 32  ;;  %p284_p1 = scmp.lt.s32.totalorder %s228_s15, %s228_s15 }
   0xc   :  { %259 = vmatpush3.bf16.msra.mxu1 %v276_v5  ;;  %v41_v32 = vunpack.c.l.bf16 %v40_v31  ;;  %p280_p0 = scmp.ne.s32.totalorder %s228_s15, %s279_s4  ;;  %p285_p2 = scmp.lt.s32.totalorder %s279_s4, %s279_s4 }
   0xd   :  { %v45_v12 = vrot.slane %v39_v10, %v44_v11  ;;  %267 = vmatpush3.bf16.msra.mxu0 %v278_v20  ;;  %v100_v23 = vrot.slane %v96_v22, %v44_v11 }
   0xe   :  { %v163_v33 = vrot.slane %v41_v32, %v44_v11  ;;  %p286_p3 = por %p285_p2, %p284_p1 }
  0x10   :  { %p287_p4 = pnand %p286_p3, %p280_p0 }
  0xc6   :  { %v88_v13 = vpop.f32.mrf.mxu0 }
  0xc7   :  { %v89_v14 = vadd.f32 %v88_v13, %v45_v12 }
  0xc8   :  { %v254_v15 = vpop.f32.mrf.mxu0 }
  0xc9   :  { %v94_v16 = vmax.f32 %v89_v14, 0.0 }
  0xca   :  { %v91_v17 = vpop.f32.mrf.mxu0 }
  0xcb   :  { %v101_v18 = vpack.c.bf16 %v94_v16, %v94_v16 }
  0xcc   :  { %v255_v19 = vpop.f32.mrf.mxu0 }
  0xcd   :  { %261 = vmatmul.mubr.msk.bf16.vlgmr.msra.gmra.mxu1 %vm114_vm3, %v101_v18 }
 0x18d   :  { %v152_v24 = vpop.f32.mrf.mxu1 }
 0x18e   :  { %v153_v25 = vadd.f32 %v152_v24, %v100_v23 }
 0x18f   :  { %v262_v26 = vpop.f32.mrf.mxu1 }
 0x190   :  { %v158_v27 = vmax.f32 %v153_v25, 0.0 }
 0x191   :  { %v155_v28 = vpop.f32.mrf.mxu1 }
 0x192   :  { %v159_v29 = vpack.c.bf16 %v158_v27, %v158_v27 }
 0x193   :  { %v263_v30 = vpop.f32.mrf.mxu1 }
 0x194   :  { %269 = vmatmul.mubr.msk.bf16.vlgmr.msra.gmra.mxu0 %vm114_vm3, %v159_v29 }
 0x254   :  { %v213_v34 = vpop.f32.mrf.mxu0 }
 0x255   :  { %v214_v35 = vadd.f32 %v213_v34, %v163_v33 }
 0x256   :  { %v270_v36 = vpop.f32.mrf.mxu0 }
 0x257   :  { %220 = vst.msk [vmem:[#allocation2] sm:$0x3] %vm219_vm4, %v214_v35 }
 0x258   :  { %v216_v37 = vpop.f32.mrf.mxu0 }
 0x259   :  { %290 = shalt.err (!%p287_p4)
}
 0x25a   :  { %230 = dma.vmem_to_hbm [thread:$0]  %s228_s15, 32, %s383_s7, [#allocation3]   ;;  %v271_v38 = vpop.f32.mrf.mxu0 }
 0x25b   :  { %299 = dma.done.wait [#allocation3], 32  }
 0x25c   :  { %300 = vsyncadd [#allocation3], 4294967264 }
 0x25d   :  { %234 = vsyncpa [#allocation3], 1 }

</bundles_post_ra>
